<compile_context>
chip_gen: v7x
topology: tpu7x:2x2x1
jax: 0.10.0
libtpu: 0.0.40
codegen_flags: <defaults>
</compile_context>

<pallas_src>
import math
import functools

import jax
import jax.numpy as jnp
from jax import lax
from jax.experimental import pallas as pl
from jax.experimental.pallas import tpu as pltpu


def _round_up(x, m):
    return ((x + m - 1) // m) * m


def bert_att_output_kernel(x_ref, res_ref, w_ref, b_ref, gamma_ref, beta_ref,
                           o_ref):
    # x_ref   : (TILE_M, H)  hidden_states tile (native dtype)
    # res_ref : (TILE_M, H)  input_tensor (residual) tile
    # w_ref   : (H, H)       dense weight in PyTorch [out, in] layout
    # b_ref, gamma_ref, beta_ref : (1, H)
    x = x_ref[...]
    w = w_ref[...]

    # Dense: y = x @ W.T, contracting x's last dim with W's last (in) dim.
    # No transpose materialized; MXU accumulates in f32.
    y = lax.dot_general(
        x, w,
        dimension_numbers=(((1,), (1,)), ((), ())),
        preferred_element_type=jnp.float32,
    )
    y = y + b_ref[...].astype(jnp.float32)

    # Dropout is identity in eval mode.
    # TODO(synk): training-mode dropout (stochastic masking) not implemented.

    # Residual add + LayerNorm over hidden dim, eps = 1e-12 (f32 stats).
    z = y + res_ref[...].astype(jnp.float32)
    mean = jnp.mean(z, axis=-1, keepdims=True)
    zc = z - mean
    var = jnp.mean(zc * zc, axis=-1, keepdims=True)
    inv = lax.rsqrt(var + 1e-12)
    zn = zc * inv
    zn = zn * gamma_ref[...].astype(jnp.float32) + beta_ref[...].astype(jnp.float32)

    # Exact erf-based gelu (matches the PyTorch reference implementation).
    g = zn * 0.5 * (1.0 + lax.erf(zn * (1.0 / math.sqrt(2.0))))

    o_ref[...] = g.astype(o_ref.dtype)


@functools.partial(jax.jit, static_argnames=("tile_m",))
def bert_att_output(hidden_states, input_tensor, weight, bias, gamma, beta,
                    *, tile_m=512):
    """hidden_states, input_tensor: [B, S, H]; weight: [H, H] (PyTorch
    out x in layout); bias, gamma, beta: [H]."""
    B, S, H = hidden_states.shape
    M = B * S

    x2d = hidden_states.reshape(M, H)
    r2d = input_tensor.reshape(M, H)

    # Tile size: multiple of 8 sublanes, 256-aligned when M is large enough
    # (clean MXU cadence on v6e/v7x), never larger than the (padded) problem.
    tm = min(tile_m, _round_up(M, 8))
    m_pad = _round_up(M, tm)
    if m_pad != M:
        # Padded rows compute garbage but stay finite (z = bias for zero rows);
        # they are sliced off below.
        x2d = jnp.pad(x2d, ((0, m_pad - M), (0, 0)))
        r2d = jnp.pad(r2d, ((0, m_pad - M), (0, 0)))

    b2d = bias.reshape(1, H)
    g2d = gamma.reshape(1, H)
    be2d = beta.reshape(1, H)

    grid = (m_pad // tm,)

    out = pl.pallas_call(
        bert_att_output_kernel,
        out_shape=jax.ShapeDtypeStruct((m_pad, H), hidden_states.dtype),
        grid_spec=pltpu.PrefetchScalarGridSpec(
            num_scalar_prefetch=0,
            grid=grid,
            in_specs=[
                pl.BlockSpec((tm, H), lambda i: (i, 0)),     # x: streamed
                pl.BlockSpec((tm, H), lambda i: (i, 0)),     # residual: streamed
                pl.BlockSpec((H, H), lambda i: (0, 0)),      # weight: resident
                pl.BlockSpec((1, H), lambda i: (0, 0)),      # bias: resident
                pl.BlockSpec((1, H), lambda i: (0, 0)),      # gamma: resident
                pl.BlockSpec((1, H), lambda i: (0, 0)),      # beta: resident
            ],
            out_specs=pl.BlockSpec((tm, H), lambda i: (i, 0)),
        ),
        compiler_params=pltpu.CompilerParams(
            # No cross-step carry -> M tiles are independent; lets v7x shard
            # the loop across both TensorCores.
            dimension_semantics=("parallel",),
            # Headroom below v7x's 64 MiB physical VMEM; above 16/32 MiB
            # default scoped limits on v5e/v6e.
            vmem_limit_bytes=48 * 1024 * 1024,
        ),
    )(x2d, r2d, weight, b2d, g2d, be2d)

    if m_pad != M:
        out = out[:M]
    return out.reshape(B, S, H)


def _reference(hidden_states, input_tensor, weight, bias, gamma, beta):
    y = jnp.einsum("bsh,oh->bso", hidden_states, weight,
                   precision=lax.Precision.HIGHEST) + bias
    z = y + input_tensor
    mean = jnp.mean(z, axis=-1, keepdims=True)
    var = jnp.mean((z - mean) ** 2, axis=-1, keepdims=True)
    zn = (z - mean) / jnp.sqrt(var + 1e-12)
    zn = zn * gamma + beta
    return zn * 0.5 * (1.0 + lax.erf(zn / jnp.sqrt(2.0)))


if __name__ == "__main__":
    # Small but lane-friendly shapes (H is a multiple of 128 so the tiled
    # path is actually exercised the way real BERT sizes would exercise it).
    B, S, H = 2, 8, 128  # batch, seq, hidden_size

    key = jax.random.PRNGKey(0)
    k1, k2, k3, k4 = jax.random.split(key, 4)

    hidden_states = jax.random.normal(k1, (B, S, H), dtype=jnp.float32)
    input_tensor = jax.random.normal(k2, (B, S, H), dtype=jnp.float32)

    # Deterministic synthetic parameters (PyTorch nn.Linear-style init).
    bound = 1.0 / math.sqrt(H)
    weight = jax.random.uniform(k3, (H, H), minval=-bound, maxval=bound,
                                dtype=jnp.float32)
    bias = jax.random.uniform(k4, (H,), minval=-bound, maxval=bound,
                              dtype=jnp.float32)
    gamma = jnp.ones((H,), dtype=jnp.float32)
    beta = jnp.zeros((H,), dtype=jnp.float32)

    out = bert_att_output(hidden_states, input_tensor, weight, bias, gamma,
                          beta)
    out = jax.block_until_ready(out)

    ref = _reference(hidden_states, input_tensor, weight, bias, gamma, beta)
    assert out.shape == (B, S, H)
    max_err = jnp.max(jnp.abs(out - ref))
    assert jnp.allclose(out, ref, atol=1e-4, rtol=1e-4), f"max err {max_err}"

    print("KERNEL_OK")
</pallas_src>

<mosaic_0001>
module attributes {stable_mosaic.version = 11 : i64} {
  func.func @bert_att_output_kernel(%arg0: i32, %arg1: memref<16x128xf32, #tpu.memory_space<vmem>>, %arg2: memref<16x128xf32, #tpu.memory_space<vmem>>, %arg3: memref<128x128xf32, #tpu.memory_space<vmem>>, %arg4: memref<1x128xf32, #tpu.memory_space<vmem>>, %arg5: memref<1x128xf32, #tpu.memory_space<vmem>>, %arg6: memref<1x128xf32, #tpu.memory_space<vmem>>, %arg7: memref<16x128xf32, #tpu.memory_space<vmem>>) attributes {dimension_semantics = [#tpu.dimension_semantics<parallel>], iteration_bounds = array<i64: 1>, scalar_prefetch = 0 : i64, scratch_operands = 0 : i64, tpu.core_type = #tpu.core_type<tc>, window_params = [{transform_indices = @transform_0, window_bounds = array<i64: 16, 128>}, {transform_indices = @transform_1, window_bounds = array<i64: 16, 128>}, {pipeline_mode = #tpu.pipeline_mode<synchronous>, transform_indices = @transform_2, window_bounds = array<i64: 128, 128>}, {pipeline_mode = #tpu.pipeline_mode<synchronous>, transform_indices = @transform_3, window_bounds = array<i64: 1, 128>}, {pipeline_mode = #tpu.pipeline_mode<synchronous>, transform_indices = @transform_4, window_bounds = array<i64: 1, 128>}, {pipeline_mode = #tpu.pipeline_mode<synchronous>, transform_indices = @transform_5, window_bounds = array<i64: 1, 128>}, {transform_indices = @transform_6, window_bounds = array<i64: 16, 128>}]} {
    %c0 = arith.constant 0 : index
    %c0_0 = arith.constant 0 : index
    %0 = vector.load %arg1[%c0, %c0_0] : memref<16x128xf32, #tpu.memory_space<vmem>>, vector<16x128xf32>
    %c0_1 = arith.constant 0 : index
    %c0_2 = arith.constant 0 : index
    %1 = vector.load %arg3[%c0_1, %c0_2] : memref<128x128xf32, #tpu.memory_space<vmem>>, vector<128x128xf32>
    %cst = arith.constant dense<0.000000e+00> : vector<16x128xf32>
    %2 = tpu.matmul %0, %1, %cst {dimension_numbers = #tpu.dot_dimension_numbers<[1], [1], [0], [0], [0, 0, 1, 0], [], []>} : vector<16x128xf32>, vector<128x128xf32>, vector<16x128xf32> -> vector<16x128xf32>
    %c0_3 = arith.constant 0 : index
    %c0_4 = arith.constant 0 : index
    %3 = vector.load %arg4[%c0_3, %c0_4] : memref<1x128xf32, #tpu.memory_space<vmem>>, vector<1x128xf32>
    %4 = vector.broadcast %3 : vector<1x128xf32> to vector<16x128xf32>
    %5 = arith.addf %2, %4 : vector<16x128xf32>
    %c0_5 = arith.constant 0 : index
    %c0_6 = arith.constant 0 : index
    %6 = vector.load %arg2[%c0_5, %c0_6] : memref<16x128xf32, #tpu.memory_space<vmem>>, vector<16x128xf32>
    %7 = arith.addf %5, %6 : vector<16x128xf32>
    %cst_7 = arith.constant dense<0.000000e+00> : vector<16xf32>
    %8 = vector.multi_reduction <add>, %7, %cst_7 [1] : vector<16x128xf32> to vector<16xf32>
    %9 = vector.shape_cast %8 : vector<16xf32> to vector<16x1xf32>
    %cst_8 = arith.constant 1.280000e+02 : f32
    %10 = vector.broadcast %cst_8 : f32 to vector<16x1xf32>
    %11 = arith.divf %9, %10 : vector<16x1xf32>
    %12 = vector.broadcast %11 : vector<16x1xf32> to vector<16x128xf32>
    %13 = arith.subf %7, %12 : vector<16x128xf32>
    %14 = arith.mulf %13, %13 : vector<16x128xf32>
    %cst_9 = arith.constant dense<0.000000e+00> : vector<16xf32>
    %15 = vector.multi_reduction <add>, %14, %cst_9 [1] : vector<16x128xf32> to vector<16xf32>
    %16 = vector.shape_cast %15 : vector<16xf32> to vector<16x1xf32>
    %cst_10 = arith.constant 1.280000e+02 : f32
    %17 = vector.broadcast %cst_10 : f32 to vector<16x1xf32>
    %18 = arith.divf %16, %17 : vector<16x1xf32>
    %cst_11 = arith.constant 9.99999996E-13 : f32
    %19 = vector.broadcast %cst_11 : f32 to vector<16x1xf32>
    %20 = arith.addf %18, %19 : vector<16x1xf32>
    %21 = math.rsqrt %20 : vector<16x1xf32>
    %22 = vector.broadcast %21 : vector<16x1xf32> to vector<16x128xf32>
    %23 = arith.mulf %13, %22 : vector<16x128xf32>
    %c0_12 = arith.constant 0 : index
    %c0_13 = arith.constant 0 : index
    %24 = vector.load %arg5[%c0_12, %c0_13] : memref<1x128xf32, #tpu.memory_space<vmem>>, vector<1x128xf32>
    %25 = vector.broadcast %24 : vector<1x128xf32> to vector<16x128xf32>
    %26 = arith.mulf %23, %25 : vector<16x128xf32>
    %c0_14 = arith.constant 0 : index
    %c0_15 = arith.constant 0 : index
    %27 = vector.load %arg6[%c0_14, %c0_15] : memref<1x128xf32, #tpu.memory_space<vmem>>, vector<1x128xf32>
    %28 = vector.broadcast %27 : vector<1x128xf32> to vector<16x128xf32>
    %29 = arith.addf %26, %28 : vector<16x128xf32>
    %cst_16 = arith.constant 5.000000e-01 : f32
    %30 = vector.broadcast %cst_16 : f32 to vector<16x128xf32>
    %31 = arith.mulf %29, %30 : vector<16x128xf32>
    %cst_17 = arith.constant 0.707106769 : f32
    %32 = vector.broadcast %cst_17 : f32 to vector<16x128xf32>
    %33 = arith.mulf %29, %32 : vector<16x128xf32>
    %34 = math.erf %33 : vector<16x128xf32>
    %cst_18 = arith.constant 1.000000e+00 : f32
    %35 = vector.broadcast %cst_18 : f32 to vector<16x128xf32>
    %36 = arith.addf %35, %34 : vector<16x128xf32>
    %37 = arith.mulf %31, %36 : vector<16x128xf32>
    %c0_19 = arith.constant 0 : index
    %c0_20 = arith.constant 0 : index
    %38 = vector.load %arg7[%c0_19, %c0_20] : memref<16x128xf32, #tpu.memory_space<vmem>>, vector<16x128xf32>
    tpu.vector_store %arg7[%c0_19, %c0_20], %37 {strides = array<i32>} : memref<16x128xf32, #tpu.memory_space<vmem>>, vector<16x128xf32>,
    return
  }
  func.func @transform_0(%arg0: i32) -> (i32, i32) {
    %c0_i32 = arith.constant 0 : i32
    %c0_i32_0 = arith.constant 0 : i32
    return %arg0, %c0_i32 : i32, i32
  }
  func.func @transform_1(%arg0: i32) -> (i32, i32) {
    %c0_i32 = arith.constant 0 : i32
    %c0_i32_0 = arith.constant 0 : i32
    return %arg0, %c0_i32 : i32, i32
  }
  func.func @transform_2(%arg0: i32) -> (i32, i32) {
    %c0_i32 = arith.constant 0 : i32
    %c0_i32_0 = arith.constant 0 : i32
    %c0_i32_1 = arith.constant 0 : i32
    return %c0_i32, %c0_i32_0 : i32, i32
  }
  func.func @transform_3(%arg0: i32) -> (i32, i32) {
    %c0_i32 = arith.constant 0 : i32
    %c0_i32_0 = arith.constant 0 : i32
    %c0_i32_1 = arith.constant 0 : i32
    return %c0_i32, %c0_i32_0 : i32, i32
  }
  func.func @transform_4(%arg0: i32) -> (i32, i32) {
    %c0_i32 = arith.constant 0 : i32
    %c0_i32_0 = arith.constant 0 : i32
    %c0_i32_1 = arith.constant 0 : i32
    return %c0_i32, %c0_i32_0 : i32, i32
  }
  func.func @transform_5(%arg0: i32) -> (i32, i32) {
    %c0_i32 = arith.constant 0 : i32
    %c0_i32_0 = arith.constant 0 : i32
    %c0_i32_1 = arith.constant 0 : i32
    return %c0_i32, %c0_i32_0 : i32, i32
  }
  func.func @transform_6(%arg0: i32) -> (i32, i32) {
    %c0_i32 = arith.constant 0 : i32
    %c0_i32_0 = arith.constant 0 : i32
    return %arg0, %c0_i32 : i32, i32
  }
}

</mosaic_0001>

<bundles_post_ra>
// kernel: bert_att_output.1
= control target key start
LH: loop header
LB: loop body
LE: loop exit
PB: predicated region body
PF: predicated region fallthrough
CT: control target
= control target key end

     0   :  { %11 = vsyncpa [#allocation3], 0  ;;  %s500_s0 = inlined_call_operand.vmem [shape: f32[16,128], index: 0, kind: input, shape index: {}]   ;;  %s501_s1 = inlined_call_operand.hbm [shape: f32[16,128], index: 1, kind: input, shape index: {}]   ;;  %s502_s2 = inlined_call_operand.hbm [shape: f32[128,128], index: 2, kind: input, shape index: {}]   ;;  %s503_s3 = inlined_call_operand.vmem [shape: f32[1,128], index: 3, kind: input, shape index: {}]   ;;  %s504_s4 = inlined_call_operand.vmem [shape: f32[1,128], index: 4, kind: input, shape index: {}]   ;;  %s505_s5 = inlined_call_operand.vmem [shape: f32[1,128], index: 5, kind: input, shape index: {}]   ;;  %s506_s6 = inlined_call_operand.hbm [shape: f32[16,128], index: 6, kind: output, shape index: {}]  }
   0x1   :  { %12 = vsyncpa [#allocation6], 0 }
   0x2   :  { %13 = vsyncpa [#allocation4], 0  ;;  %s400_s21 = smov [#allocation2]   ;;  %s328_s25 = scalar_lea.hbm %s501_s1, 256 }
   0x3   :  { %s21_s22 = sshll.u32 %s400_s21, 4  ;;  %p329_p0 = scmp.ne.s32.totalorder %s501_s1, %s328_s25  ;;  %s22_s22 = int_to_ptr.vmem [resolvable:$true] %s21_s22 }
   0x4   :  { %p332_p1 = scmp.lt.u32.totalorder %s328_s25, %s501_s1 }
   0x6   :  { %p334_p2 = pnand %p332_p1, %p329_p0 }
   0x8   :  { %337 = shalt.err (!%p334_p2)
}
   0x9   :  { %s338_s30 = scalar_lea.vmem %s22_s22, 256  ;;  %p343_p4 = scmp.lt.s32.totalorder %s22_s22, %s22_s22 }
   0xa   :  { %p339_p3 = scmp.ne.s32.totalorder %s22_s22, %s338_s30  ;;  %p344_p5 = scmp.lt.s32.totalorder %s338_s30, %s338_s30 }
   0xc   :  { %p345_p6 = por %p344_p5, %p343_p4 }
   0xe   :  { %p346_p7 = pnand %p345_p6, %p339_p3 }
  0x10   :  { %349 = shalt.err (!%p346_p7)
}
  0x11   :  { %s401_s7 = smov 128   ;;  %s402_s8 = smov 8  }
  0x12   :  { %27 = dma.hbm_to_vmem [thread:$0]  %s501_s1, 256, %s22_s22, [#allocation3], %s401_s7, %s401_s7, %s402_s8  }
  0x13   :  { %s403_s11 = smov [#allocation5]   ;;  %s350_s15 = scalar_lea.hbm %s502_s2, 2048 }
  0x14   :  { %s33_s12 = sshll.u32 %s403_s11, 4  ;;  %p351_p8 = scmp.ne.s32.totalorder %s502_s2, %s350_s15  ;;  %s34_s12 = int_to_ptr.vmem [resolvable:$true] %s33_s12 }
  0x15   :  { %p354_p9 = scmp.lt.u32.totalorder %s350_s15, %s502_s2 }
  0x17   :  { %p356_p10 = pnand %p354_p9, %p351_p8 }
  0x19   :  { %359 = shalt.err (!%p356_p10)
}
  0x1a   :  { %s360_s20 = scalar_lea.vmem %s34_s12, 2048  ;;  %p365_p12 = scmp.lt.s32.totalorder %s34_s12, %s34_s12 }
  0x1b   :  { %p361_p11 = scmp.ne.s32.totalorder %s34_s12, %s360_s20  ;;  %p366_p13 = scmp.lt.s32.totalorder %s360_s20, %s360_s20 }
  0x1d   :  { %p367_p0 = por %p366_p13, %p365_p12 }
  0x1f   :  { %p368_p1 = pnand %p367_p0, %p361_p11 }
  0x21   :  { %371 = shalt.err (!%p368_p1)
}
  0x22   :  { %39 = dma.hbm_to_vmem [thread:$0]  %s502_s2, 2048, %s34_s12, [#allocation6], %s401_s7, %s401_s7, %s402_s8  }
  0x23   :  { %394 = dma.done.wait [#allocation3], 256  }
  0x24   :  { %395 = vsyncadd [#allocation3], 4294967040 }
  0x25   :  { %396 = dma.done.wait [#allocation6], 2048  }
  0x26   :  { %397 = vsyncadd [#allocation6], 4294965248  ;;  %v54_v0 = vld [vmem:[#allocation5] sm:$0xff]  ;;  %v55_v1 = vld [vmem:[#allocation5 + $0x8] sm:$0xff] }
  0x27   :  { %v56_v2 = vld [vmem:[#allocation5 + $0x10] sm:$0xff]  ;;  %v283_v3 = vpack.c.bf16 %v55_v1, %v54_v0  ;;  %v57_v4 = vld [vmem:[#allocation5 + $0x18] sm:$0xff]  ;;  %v58_v7 = vld [vmem:[#allocation5 + $0x20] sm:$0xff] }
  0x28   :  { %v287_v5 = vpack.c.bf16 %v57_v4, %v56_v2  ;;  %v52_v6 = vld [vmem:[%s500_s0] sm:$0xff]  ;;  %v59_v8 = vld [vmem:[#allocation5 + $0x28] sm:$0xff]  ;;  %v61_v11 = vld [vmem:[#allocation5 + $0x38] sm:$0xff] }
  0x29   :  { %284 = vmatprep.subr.bf16.mxu0 %v283_v3  ;;  %280 = vmatprep.mubr.f32.mxu0 %v52_v6  ;;  %v291_v9 = vpack.c.bf16 %v59_v8, %v58_v7  ;;  %v60_v10 = vld [vmem:[#allocation5 + $0x30] sm:$0xff]  ;;  %v62_v13 = vld [vmem:[#allocation5 + $0x40] sm:$0xff]  ;;  %v63_v14 = vld [vmem:[#allocation5 + $0x48] sm:$0xff] }
  0x2a   :  { %286 = vmatpush3.bf16.xpose.msra.mxu0 %v283_v3  ;;  %v295_v12 = vpack.c.bf16 %v61_v11, %v60_v10  ;;  %v299_v15 = vpack.c.bf16 %v63_v14, %v62_v13  ;;  %v64_v16 = vld [vmem:[#allocation5 + $0x50] sm:$0xff]  ;;  %v65_v17 = vld [vmem:[#allocation5 + $0x58] sm:$0xff]  ;;  %v66_v19 = vld [vmem:[#allocation5 + $0x60] sm:$0xff] }
  0x2b   :  { %288 = vmatprep.subr.bf16.mxu0 %v287_v5  ;;  %v303_v18 = vpack.c.bf16 %v65_v17, %v64_v16  ;;  %v67_v20 = vld [vmem:[#allocation5 + $0x68] sm:$0xff]  ;;  %v68_v22 = vld [vmem:[#allocation5 + $0x70] sm:$0xff]  ;;  %v69_v23 = vld [vmem:[#allocation5 + $0x78] sm:$0xff] }
  0x2c   :  { %v307_v21 = vpack.c.bf16 %v67_v20, %v66_v19  ;;  %v311_v24 = vpack.c.bf16 %v69_v23, %v68_v22  ;;  %v53_v25 = vld [vmem:[%s500_s0 + $0x8] sm:$0xff]  ;;  %v227_v26 = vld [vmem:[%s503_s3] ss:$0 sm:$0xff] }
  0x2d   :  { %v152_v29 = vld [vmem:[#allocation2] sm:$0xff]  ;;  %v153_v33 = vld [vmem:[#allocation2 + $0x8] sm:$0xff] }
  0x2e   :  { %v228_v50 = vld [vmem:[%s504_s4] ss:$0 sm:$0xff]  ;;  %s404_s4 = smov [#allocation7]  }
  0x2f   :  { %v229_v52 = vld [vmem:[%s505_s5] ss:$0 sm:$0xff]  ;;  %s214_s29 = sshll.u32 %s404_s4, 4  ;;  %s215_s29 = int_to_ptr.vmem [resolvable:$true] %s214_s29 }
  0x30   :  { %s372_s5 = scalar_lea.vmem %s215_s29, 256  ;;  %p377_p3 = scmp.lt.s32.totalorder %s215_s29, %s215_s29 }
  0x31   :  { %p373_p2 = scmp.ne.s32.totalorder %s215_s29, %s372_s5  ;;  %p378_p4 = scmp.lt.s32.totalorder %s372_s5, %s372_s5 }
  0x32   :  { %290 = vmatpush3.bf16.xpose.msra.mxu0 %v287_v5 }
  0x33   :  { %292 = vmatprep.subr.bf16.mxu0 %v291_v9  ;;  %p379_p5 = por %p378_p4, %p377_p3 }
  0x35   :  { %p380_p6 = pnand %p379_p5, %p373_p2 }
  0x3a   :  { %294 = vmatpush3.bf16.xpose.msra.mxu0 %v291_v9 }
  0x3b   :  { %296 = vmatprep.subr.bf16.mxu0 %v295_v12 }
  0x42   :  { %298 = vmatpush3.bf16.xpose.msra.mxu0 %v295_v12 }
  0x43   :  { %300 = vmatprep.subr.bf16.mxu0 %v299_v15 }
  0x4a   :  { %302 = vmatpush3.bf16.xpose.msra.mxu0 %v299_v15 }
  0x4b   :  { %304 = vmatprep.subr.bf16.mxu0 %v303_v18 }
  0x52   :  { %306 = vmatpush3.bf16.xpose.msra.mxu0 %v303_v18 }
  0x53   :  { %308 = vmatprep.subr.bf16.mxu0 %v307_v21 }
  0x5a   :  { %310 = vmatpush3.bf16.xpose.msra.mxu0 %v307_v21 }
  0x5b   :  { %312 = vmatprep.subr.bf16.mxu0 %v311_v24 }
  0x62   :  { %314 = vmatpush3.bf16.xpose.msra.mxu0 %v311_v24 }
  0x69   :  { %281 = vmatmul.mubr.f32.vlgmr.msra.gmra.mrb[0].mxu0 %v53_v25 }
 0x13c   :  { %v282_v27 = vpop.f32.mrb[0].mxu0 }
 0x13d   :  { %v143_v28 = vpop.f32.mrb[1].mxu0  ;;  %v149_v31 = vadd.f32 %v282_v27, %v227_v26 }
 0x13e   :  { %v144_v30 = vadd.f32 %v227_v26, %v143_v28 }
 0x13f   :  { %v155_v34 = vadd.f32 %v153_v33, %v149_v31 }
 0x140   :  { %v154_v32 = vadd.f32 %v152_v29, %v144_v30 }
 0x142   :  { %156 = vadd.xlane.f32.xlu0 %v154_v32 }
 0x146   :  { %158 = vadd.xlane.f32.xlu0 %v155_v34 }
 0x1cf   :  { %v157_v35 = vpop.xlane.xlu0 %156 }
 0x1d0   :  { %v161_v36 = vmul.f32 0.0078125, %v157_v35 }
 0x1d2   :  { %v163_v37 = vsub.f32 %v154_v32, %v161_v36 }
 0x1d3   :  { %v159_v38 = vpop.xlane.xlu0 %158 }
 0x1d4   :  { %v162_v39 = vmul.f32 0.0078125, %v159_v38  ;;  %v165_v40 = vmul.f32 %v163_v37, %v163_v37 }
 0x1d6   :  { %v164_v41 = vsub.f32 %v155_v34, %v162_v39  ;;  %167 = vadd.xlane.f32.xlu1 %v165_v40 }
 0x1d8   :  { %v166_v42 = vmul.f32 %v164_v41, %v164_v41 }
 0x1da   :  { %169 = vadd.xlane.f32.xlu1 %v166_v42 }
 0x263   :  { %v168_v43 = vpop.xlane.xlu1 %167 }
 0x264   :  { %v171_v44 = vmul.f32 0.0078125, %v168_v43 }
 0x266   :  { %v173_v45 = vadd.f32 1e-12, %v171_v44 }
 0x267   :  { %v170_v46 = vpop.xlane.xlu1 %169 }
 0x268   :  { %320 = vrsqrt.f32 %v173_v45  ;;  %v172_v47 = vmul.f32 0.0078125, %v170_v46 }
 0x26a   :  { %v174_v48 = vadd.f32 1e-12, %v172_v47 }
 0x26c   :  { %322 = vrsqrt.f32 %v174_v48 }
 0x272   :  { %v321_v49 = vpop.eup %320 }
 0x273   :  { %v177_v51 = vmul.f32 %v321_v49, %v163_v37 }
 0x275   :  { %v186_v53 = vmul.f32 %v228_v50, %v177_v51 }
 0x276   :  { %v323_v54 = vpop.eup %322 }
 0x277   :  { %v178_v55 = vmul.f32 %v323_v54, %v164_v41  ;;  %v195_v56 = vadd.f32 %v229_v52, %v186_v53 }
 0x279   :  { %v187_v57 = vmul.f32 %v228_v50, %v178_v55  ;;  %v199_v58 = vmul.f32 0.70710677, %v195_v56  ;;  %v197_v62 = vmul.f32 0.5, %v195_v56 }
 0x27b   :  { %v196_v59 = vadd.f32 %v229_v52, %v187_v57  ;;  %324 = verf.f32 %v199_v58 }
 0x27d   :  { %v200_v60 = vmul.f32 0.70710677, %v196_v59  ;;  %v198_v2 = vmul.f32 0.5, %v196_v59 }
 0x27f   :  { %326 = verf.f32 %v200_v60 }
 0x285   :  { %v325_v61 = vpop.eup %324 }
 0x286   :  { %v203_v63 = vadd.f32 1.0, %v325_v61 }
 0x288   :  { %v205_v0 = vmul.f32 %v203_v63, %v197_v62 }
 0x289   :  { %v327_v1 = vpop.eup %326 }
 0x28a   :  { %v204_v3 = vadd.f32 1.0, %v327_v1  ;;  %207 = vst [vmem:[#allocation7] sm:$0xff] %v205_v0 }
 0x28c   :  { %v206_v4 = vmul.f32 %v204_v3, %v198_v2 }
 0x28e   :  { %208 = vst [vmem:[#allocation7 + $0x8] sm:$0xff] %v206_v4 }
 0x28f   :  { %383 = shalt.err (!%p380_p6)
}
 0x290   :  { %s384_s10 = scalar_lea.hbm %s506_s6, 256 }
 0x291   :  { %p385_p7 = scmp.ne.s32.totalorder %s506_s6, %s384_s10  ;;  %p388_p8 = scmp.lt.u32.totalorder %s384_s10, %s506_s6 }
 0x293   :  { %p390_p9 = pnand %p388_p8, %p385_p7 }
 0x295   :  { %393 = shalt.err (!%p390_p9)
}
 0x296   :  { %220 = dma.vmem_to_hbm [thread:$0]  %s215_s29, 256, %s506_s6, [#allocation4], %s401_s7, %s401_s7, %s402_s8  }
 0x297   :  { %398 = dma.done.wait [#allocation4], 256  }
 0x298   :  { %399 = vsyncadd [#allocation4], 4294967040 }
 0x299   :  { %224 = vsyncpa [#allocation3], 1 }
 0x29a   :  { %225 = vsyncpa [#allocation6], 1 }
 0x29b   :  { %226 = vsyncpa [#allocation4], 1 }

</bundles_post_ra>
